<compile_context>
chip_gen: v6e
topology: v6e:2x2x1
jax: 0.10.0
libtpu: 0.0.40
codegen_flags: <defaults>
</compile_context>

<pallas_src>
import functools

import jax
import jax.numpy as jnp
from jax import lax
from jax.experimental import pallas as pl
from jax.experimental.pallas import tpu as pltpu

LOG_CLAMP = -100.0                  # PyTorch BCELoss clamps log values at -100
MAX_BLOCK_BYTES = 2 * 1024 * 1024   # combined x+y bytes per grid step (per pipeline buffer)
MAX_TILE_ROWS = 4096
NUM_PARTIALS = 2                    # leading "parallel" axis -> both TensorCores on v7x


def _sublane_multiple(dtype):
    # sublane packing: 8 rows for 4-byte, 16 for 2-byte (bf16), 32 for 1-byte (int8/bool)
    return {1: 32, 2: 16}.get(jnp.dtype(dtype).itemsize, 8)


def _panns_bce_kernel(x_ref, y_ref, out_ref, acc_ref, *,
                      rows_per_block, total_rows, steps_per_partial,
                      group, needs_mask):
    i = pl.program_id(1)

    @pl.when(i == 0)
    def _():
        acc_ref[...] = jnp.zeros_like(acc_ref)

    x = x_ref[...].astype(jnp.float32)   # storage dtype (f32/bf16/...) -> f32 math
    y = y_ref[...].astype(jnp.float32)

    # Sanitize exactly like the module: NaN -> 0, +-Inf -> 0, x>1 -> 1.
    # abs(x) < inf is False for NaN and +-Inf.  The lower clamp to 0 documents the
    # valid BCE domain (PyTorch would raise for x < 0).
    x = jnp.where(jnp.abs(x) < jnp.inf, jnp.clip(x, 0.0, 1.0), 0.0)

    log_x = jnp.maximum(jnp.log(x), LOG_CLAMP)
    log_1mx = jnp.maximum(jnp.log(1.0 - x), LOG_CLAMP)

    # contrib = -(per-element BCE); the final negate happens in the wrapper.
    contrib = y * (log_x - log_1mx) + log_1mx

    if needs_mask:
        # Mask ragged-tail / clamped-block rows AFTER the loss (select kills NaN).
        p = pl.program_id(0)
        row0 = (p * steps_per_partial + i) * rows_per_block
        row_ids = row0 + lax.broadcasted_iota(jnp.int32, (rows_per_block, 1), 0)
        contrib = jnp.where(row_ids < total_rows, contrib, 0.0)

    if group > 1:
        # Tree of cross-vreg VALU adds down to one (8, classes) slab; no XLU.
        contrib = contrib.reshape(group, *acc_ref.shape).sum(axis=0)
    acc_ref[...] += contrib

    @pl.when(i == pl.num_programs(1) - 1)
    def _():
        out_ref[...] = acc_ref[...].reshape(out_ref.shape)


@functools.partial(jax.jit, static_argnames=("block_rows",))
def panns_loss(clipwise_output, target, *, block_rows=None):
    """Equivalent of PANNsLoss().forward({'clipwise_output': x}, target)."""
    x, y = clipwise_output, target
    if x.ndim != 2:                      # collapse leading dims (free for contiguous arrays)
        x = x.reshape(-1, x.shape[-1])
        y = y.reshape(-1, y.shape[-1])
    rows, classes = x.shape
    n = x.size

    # ---- static tiling decisions (shape/dtype derived) ----------------------
    sub = max(_sublane_multiple(x.dtype), _sublane_multiple(y.dtype))
    bytes_per_row = classes * (jnp.dtype(x.dtype).itemsize + jnp.dtype(y.dtype).itemsize)
    tile_rows = (MAX_BLOCK_BYTES // max(bytes_per_row, 1)) // sub * sub
    tile_rows = max(sub, min(MAX_TILE_ROWS, tile_rows))
    if block_rows is not None:           # test / tuning override
        tile_rows = block_rows
    if tile_rows >= rows:
        tile_rows = rows                 # single full-extent row block
    num_blocks = pl.cdiv(rows, tile_rows)

    num_partials = NUM_PARTIALS if num_blocks >= NUM_PARTIALS else 1
    steps = pl.cdiv(num_blocks, num_partials)
    needs_clamp = num_partials * steps != num_blocks
    needs_mask = needs_clamp or (rows % tile_rows != 0)

    if tile_rows % 8 == 0:
        group, acc_rows = tile_rows // 8, 8
    else:                                # tiny / odd batch: accumulator == tile
        group, acc_rows = 1, tile_rows
    acc_shape = (acc_rows, classes)

    last_block = num_blocks - 1
    if needs_clamp:
        def in_map(p, i):
            return (jnp.minimum(p * steps + i, last_block), 0)
    else:
        def in_map(p, i):
            return (p * steps + i, 0)

    in_spec = pl.BlockSpec((tile_rows, classes), in_map)
    # TODO(synk): for extremely large class counts (8*classes*4 bytes approaching
    # VMEM) also block over the class dim; irrelevant for PANNs (527 classes).

    kernel = functools.partial(
        _panns_bce_kernel,
        rows_per_block=tile_rows, total_rows=rows,
        steps_per_partial=steps, group=group, needs_mask=needs_mask)

    partials = pl.pallas_call(
        kernel,
        out_shape=jax.ShapeDtypeStruct((num_partials,) + acc_shape, jnp.float32),
        grid_spec=pltpu.PrefetchScalarGridSpec(
            num_scalar_prefetch=0,
            grid=(num_partials, steps),
            in_specs=[in_spec, in_spec],
            out_specs=pl.BlockSpec((1,) + acc_shape, lambda p, i: (p, 0, 0)),
            scratch_shapes=[pltpu.VMEM(acc_shape, jnp.float32)],
        ),
        compiler_params=pltpu.CompilerParams(
            dimension_semantics=("parallel", "arbitrary"),  # 2 TCs on v7x, serial elsewhere
        ),
    )(x, y)

    # One tiny reduction (num_partials * 8 * classes elements), negate, and mean.
    return -jnp.sum(partials) / jnp.float32(n)


def _reference(clipwise_output, target):
    x = clipwise_output.astype(jnp.float32)
    x = jnp.where(jnp.isnan(x), 0.0, x)
    x = jnp.where(jnp.isinf(x), 0.0, x)
    x = jnp.where(x > 1.0, 1.0, x)
    y = target.astype(jnp.float32)
    log_x = jnp.maximum(jnp.log(x), LOG_CLAMP)
    log_1mx = jnp.maximum(jnp.log(1.0 - x), LOG_CLAMP)
    return jnp.mean(-(y * log_x + (1.0 - y) * log_1mx))


if __name__ == "__main__":
    key = jax.random.PRNGKey(0)
    k1, k2, k3, k4 = jax.random.split(key, 4)

    # PANNs clipwise_output: (batch, num_classes). Small demo: batch=2, 527 classes.
    batch, num_classes = 2, 527
    clipwise = jax.random.uniform(k1, (batch, num_classes), jnp.float32, 0.0, 1.2)
    # Exercise the sanitization paths (NaN -> 0, Inf -> 0, >1 -> 1).
    clipwise = clipwise.at[0, 0].set(jnp.nan)
    clipwise = clipwise.at[0, 1].set(jnp.inf)
    clipwise = clipwise.at[1, 2].set(-jnp.inf)
    target = (jax.random.uniform(k2, (batch, num_classes)) > 0.5).astype(jnp.float32)

    model_input = {"clipwise_output": clipwise}          # the module consumes a dict
    out = panns_loss(model_input["clipwise_output"], target)
    jax.block_until_ready(out)
    ref = _reference(clipwise, target)
    assert jnp.allclose(out, ref, rtol=1e-5, atol=1e-5), (out, ref)

    # Second check: ragged batch + multi-block grid + 2-partial "parallel" split +
    # in-kernel row mask, forced via a small row-block override.
    batch2 = 40
    clip2 = jax.random.uniform(k3, (batch2, num_classes), jnp.float32, 0.0, 1.1)
    clip2 = clip2.at[3, 10].set(jnp.nan)
    tgt2 = (jax.random.uniform(k4, (batch2, num_classes)) > 0.5).astype(jnp.float32)
    out2 = panns_loss(clip2, tgt2, block_rows=16)
    jax.block_until_ready(out2)
    ref2 = _reference(clip2, tgt2)
    assert jnp.allclose(out2, ref2, rtol=1e-5, atol=1e-5), (out2, ref2)

    print("KERNEL_OK")
</pallas_src>

<mosaic_0001>
module attributes {stable_mosaic.version = 11 : i64} {
  func.func @_panns_bce_kernel(%arg0: i32, %arg1: i32, %arg2: memref<2x527xf32, #tpu.memory_space<vmem>>, %arg3: memref<2x527xf32, #tpu.memory_space<vmem>>, %arg4: memref<1x2x527xf32, #tpu.memory_space<vmem>>, %arg5: memref<2x527xf32, #tpu.memory_space<vmem>>) attributes {dimension_semantics = [#tpu.dimension_semantics<parallel>, #tpu.dimension_semantics<arbitrary>], iteration_bounds = array<i64: 1, 1>, scalar_prefetch = 0 : i64, scratch_operands = 1 : i64, tpu.core_type = #tpu.core_type<tc>, window_params = [{transform_indices = @transform_0, window_bounds = array<i64: 2, 527>}, {transform_indices = @transform_1, window_bounds = array<i64: 2, 527>}, {transform_indices = @transform_2, window_bounds = array<i64: 1, 2, 527>}]} {
    %c0_i32 = arith.constant 0 : i32
    %0 = arith.cmpi eq, %arg1, %c0_i32 : i32
    %1 = arith.extui %0 : i1 to i32
    %c0_i32_0 = arith.constant 0 : i32
    %2 = arith.cmpi ne, %1, %c0_i32_0 : i32
    scf.if %2 {
      %cst_16 = arith.constant 0.000000e+00 : f32
      %31 = vector.broadcast %cst_16 : f32 to vector<2x527xf32>
      %c0_17 = arith.constant 0 : index
      %c0_18 = arith.constant 0 : index
      %32 = vector.load %arg5[%c0_17, %c0_18] : memref<2x527xf32, #tpu.memory_space<vmem>>, vector<2x527xf32>
      tpu.vector_store %arg5[%c0_17, %c0_18], %31 {strides = array<i32>} : memref<2x527xf32, #tpu.memory_space<vmem>>, vector<2x527xf32>,
    } else {
    }
    %c0 = arith.constant 0 : index
    %c0_1 = arith.constant 0 : index
    %3 = vector.load %arg2[%c0, %c0_1] : memref<2x527xf32, #tpu.memory_space<vmem>>, vector<2x527xf32>
    %c0_2 = arith.constant 0 : index
    %c0_3 = arith.constant 0 : index
    %4 = vector.load %arg3[%c0_2, %c0_3] : memref<2x527xf32, #tpu.memory_space<vmem>>, vector<2x527xf32>
    %5 = math.absf %3 : vector<2x527xf32>
    %cst = arith.constant 0x7F800000 : f32
    %6 = vector.broadcast %cst : f32 to vector<2x527xf32>
    %7 = arith.cmpf olt, %5, %6 : vector<2x527xf32>
    %cst_4 = arith.constant 0.000000e+00 : f32
    %cst_5 = arith.constant 1.000000e+00 : f32
    %8 = vector.broadcast %cst_4 : f32 to vector<2x527xf32>
    %9 = arith.maximumf %8, %3 : vector<2x527xf32>
    %10 = vector.broadcast %cst_5 : f32 to vector<2x527xf32>
    %11 = arith.minimumf %10, %9 : vector<2x527xf32>
    %cst_6 = arith.constant 0.000000e+00 : f32
    %12 = vector.broadcast %cst_6 : f32 to vector<2x527xf32>
    %13 = arith.select %7, %11, %12 : vector<2x527xi1>, vector<2x527xf32>
    %14 = math.log %13 : vector<2x527xf32>
    %cst_7 = arith.constant -1.000000e+02 : f32
    %15 = vector.broadcast %cst_7 : f32 to vector<2x527xf32>
    %16 = arith.maximumf %14, %15 : vector<2x527xf32>
    %cst_8 = arith.constant 1.000000e+00 : f32
    %17 = vector.broadcast %cst_8 : f32 to vector<2x527xf32>
    %18 = arith.subf %17, %13 : vector<2x527xf32>
    %19 = math.log %18 : vector<2x527xf32>
    %cst_9 = arith.constant -1.000000e+02 : f32
    %20 = vector.broadcast %cst_9 : f32 to vector<2x527xf32>
    %21 = arith.maximumf %19, %20 : vector<2x527xf32>
    %22 = arith.subf %16, %21 : vector<2x527xf32>
    %23 = arith.mulf %4, %22 : vector<2x527xf32>
    %24 = arith.addf %23, %21 : vector<2x527xf32>
    %c0_10 = arith.constant 0 : index
    %c0_11 = arith.constant 0 : index
    %25 = vector.load %arg5[%c0_10, %c0_11] : memref<2x527xf32, #tpu.memory_space<vmem>>, vector<2x527xf32>
    %26 = arith.addf %25, %24 : vector<2x527xf32>
    %c0_12 = arith.constant 0 : index
    %c0_13 = arith.constant 0 : index
    %27 = vector.load %arg5[%c0_12, %c0_13] : memref<2x527xf32, #tpu.memory_space<vmem>>, vector<2x527xf32>
    tpu.vector_store %arg5[%c0_12, %c0_13], %26 {strides = array<i32>} : memref<2x527xf32, #tpu.memory_space<vmem>>, vector<2x527xf32>,
    %c0_i32_14 = arith.constant 0 : i32
    %28 = arith.cmpi eq, %arg1, %c0_i32_14 : i32
    %29 = arith.extui %28 : i1 to i32
    %c0_i32_15 = arith.constant 0 : i32
    %30 = arith.cmpi ne, %29, %c0_i32_15 : i32
    scf.if %30 {
      %c0_16 = arith.constant 0 : index
      %c0_17 = arith.constant 0 : index
      %31 = vector.load %arg5[%c0_16, %c0_17] : memref<2x527xf32, #tpu.memory_space<vmem>>, vector<2x527xf32>
      %32 = vector.shape_cast %31 : vector<2x527xf32> to vector<1x2x527xf32>
      %c0_18 = arith.constant 0 : index
      %c0_19 = arith.constant 0 : index
      %c0_20 = arith.constant 0 : index
      %33 = vector.load %arg4[%c0_18, %c0_19, %c0_20] : memref<1x2x527xf32, #tpu.memory_space<vmem>>, vector<1x2x527xf32>
      tpu.vector_store %arg4[%c0_18, %c0_19, %c0_20], %32 {strides = array<i32>} : memref<1x2x527xf32, #tpu.memory_space<vmem>>, vector<1x2x527xf32>,
    } else {
    }
    return
  }
  func.func @transform_0(%arg0: i32, %arg1: i32) -> (i32, i32) {
    %c1_i32 = arith.constant 1 : i32
    %0 = arith.muli %arg0, %c1_i32 : i32
    %1 = arith.addi %0, %arg1 : i32
    %c0_i32 = arith.constant 0 : i32
    %c0_i32_0 = arith.constant 0 : i32
    return %1, %c0_i32 : i32, i32
  }
  func.func @transform_1(%arg0: i32, %arg1: i32) -> (i32, i32) {
    %c1_i32 = arith.constant 1 : i32
    %0 = arith.muli %arg0, %c1_i32 : i32
    %1 = arith.addi %0, %arg1 : i32
    %c0_i32 = arith.constant 0 : i32
    %c0_i32_0 = arith.constant 0 : i32
    return %1, %c0_i32 : i32, i32
  }
  func.func @transform_2(%arg0: i32, %arg1: i32) -> (i32, i32, i32) {
    %c0_i32 = arith.constant 0 : i32
    %c0_i32_0 = arith.constant 0 : i32
    %c0_i32_1 = arith.constant 0 : i32
    return %arg0, %c0_i32, %c0_i32_0 : i32, i32, i32
  }
}

</mosaic_0001>

<bundles_post_ra>
// kernel: panns_loss.1
= control target key start
LH: loop header
LB: loop body
LE: loop exit
PB: predicated region body
PF: predicated region fallthrough
CT: control target
= control target key end

     0   :  { %7 = vsyncpa [#allocation4], 0  ;;  %s194_s0 = inlined_call_operand.hbm [shape: f32[2,527], index: 0, kind: input, shape index: {}]   ;;  %s195_s1 = inlined_call_operand.hbm [shape: f32[2,527], index: 1, kind: input, shape index: {}]   ;;  %s196_s2 = inlined_call_operand.vmem [shape: f32[1,2,527], index: 2, kind: output, shape index: {}]  }
   0x1   :  { %8 = vsyncpa [#allocation6], 0  ;;  %s161_s9 = smov [#allocation3]   ;;  %s162_s11 = smov [#allocation5]  }
   0x2   :  { %s19_s10 = sshll.u32 %s161_s9, 4  ;;  %s33_s12 = sshll.u32 %s162_s11, 4  ;;  %s20_s10 = int_to_ptr.vmem [resolvable:$true] %s19_s10  ;;  %s34_s12 = int_to_ptr.vmem [resolvable:$true] %s33_s12 }
   0x3   :  { %s125_s13 = scalar_lea.vmem %s20_s10, 160  ;;  %p130_p1 = scmp.lt.s32.totalorder %s20_s10, %s20_s10 }
   0x4   :  { %p126_p0 = scmp.ne.s32.totalorder %s20_s10, %s125_s13  ;;  %p131_p2 = scmp.lt.s32.totalorder %s125_s13, %s125_s13 }
   0x6   :  { %p132_p3 = por %p131_p2, %p130_p1 }
   0x8   :  { %p133_p4 = pnand %p132_p3, %p126_p0 }
   0xa   :  { %136 = shalt.err (!%p133_p4)
}
   0xb   :  { %22 = dma.hbm_to_vmem [thread:$0]  %s194_s0, 160, %s20_s10, [#allocation4]  }
   0xc   :  { %s145_s16 = scalar_lea.vmem %s34_s12, 160  ;;  %p150_p6 = scmp.lt.s32.totalorder %s34_s12, %s34_s12 }
   0xd   :  { %p146_p5 = scmp.ne.s32.totalorder %s34_s12, %s145_s16  ;;  %p151_p7 = scmp.lt.s32.totalorder %s145_s16, %s145_s16 }
   0xf   :  { %p152_p8 = por %p151_p7, %p150_p6 }
  0x11   :  { %p153_p9 = pnand %p152_p8, %p146_p5 }
  0x13   :  { %156 = shalt.err (!%p153_p9)
}
  0x14   :  { %36 = dma.hbm_to_vmem [thread:$0]  %s195_s1, 160, %s34_s12, [#allocation6]  }
  0x15   :  { %157 = dma.done.wait [#allocation4], 160  }
  0x16   :  { %158 = vsyncadd [#allocation4], 4294967136 }
  0x17   :  { %159 = dma.done.wait [#allocation6], 160  }
  0x18   :  { %160 = vsyncadd [#allocation6], 4294967136  ;;  %vm50_vm0 = vcmask 115712   ;;  %v163_v0 = vmov 0.0   ;;  %v52_v1 = vld [vmem:[#allocation3] sm:$0xff]  ;;  %v54_v24 = vld [vmem:[#allocation5] sm:$0xff] }
  0x19   :  { %51 = vst.msk [vmem:[#allocation2 + $0x8] sm:$0x3] %vm50_vm0, %v163_v0  ;;  %v53_v2 = vld [vmem:[#allocation3 + $0x8] sm:$0x3]  ;;  %v56_v3 = vand.u32 2147483647, %v52_v1 }
  0x1a   :  { %v60_v4 = vmax.f32 %v52_v1, 0.0  ;;  %v61_v5 = vmax.f32 %v53_v2, 0.0  ;;  %v57_v6 = vand.u32 2147483647, %v53_v2  ;;  %v55_v27 = vld [vmem:[#allocation5 + $0x8] sm:$0x3] }
  0x1b   :  { %vm58_vm1 = vcmp.lt.f32.partialorder %v56_v3, inf }
  0x1c   :  { %v62_v7 = vmin.f32 %v60_v4, 1.0  ;;  %v63_v8 = vmin.f32 %v61_v5, 1.0  ;;  %vm59_vm2 = vcmp.lt.f32.partialorder %v57_v6, inf }
  0x1e   :  { %v64_v9 = vsel %vm58_vm1, %v62_v7, 0.0  ;;  %v65_v10 = vsel %vm59_vm2, %v63_v8, 0.0 }
  0x1f   :  { %109 = vlog2.f32 %v64_v9  ;;  %v72_v11 = vsub.f32 1.0, %v64_v9  ;;  %v73_v12 = vsub.f32 1.0, %v65_v10 }
  0x20   :  { %111 = vlog2.f32 %v65_v10  ;;  %v87_v32 = vld [vmem:[#allocation2 + $0x8] sm:$0x3] }
  0x21   :  { %113 = vlog2.f32 %v72_v11 }
  0x22   :  { %115 = vlog2.f32 %v73_v12 }
  0x2c   :  { %v110_v13 = vpop.eup %109 }
  0x2d   :  { %v112_v14 = vpop.eup %111  ;;  %v67_v15 = vmul.f32 0.6931472, %v110_v13 }
  0x2e   :  { %v114_v16 = vpop.eup %113  ;;  %v69_v17 = vmul.f32 0.6931472, %v112_v14 }
  0x2f   :  { %v116_v18 = vpop.eup %115  ;;  %v70_v19 = vmax.f32 %v67_v15, -100.0  ;;  %v75_v20 = vmul.f32 0.6931472, %v114_v16 }
  0x30   :  { %v71_v21 = vmax.f32 %v69_v17, -100.0  ;;  %v77_v22 = vmul.f32 0.6931472, %v116_v18 }
  0x31   :  { %v78_v23 = vmax.f32 %v75_v20, -100.0 }
  0x32   :  { %v79_v25 = vmax.f32 %v77_v22, -100.0 }
  0x33   :  { %v80_v26 = vsub.f32 %v70_v19, %v78_v23 }
  0x34   :  { %v81_v28 = vsub.f32 %v71_v21, %v79_v25 }
  0x35   :  { %v82_v29 = vmul.f32 %v80_v26, %v54_v24 }
  0x36   :  { %v83_v30 = vmul.f32 %v81_v28, %v55_v27 }
  0x37   :  { %v84_v31 = vadd.f32 %v82_v29, %v78_v23 }
  0x38   :  { %v85_v33 = vadd.f32 %v83_v30, %v79_v25 }
  0x39   :  { %98 = vst [vmem:[%s196_s2] sm:$0xff] %v84_v31 }
  0x3a   :  { %v89_v34 = vadd.f32 %v87_v32, %v85_v33 }
  0x3c   :  { %92 = vst.msk [vmem:[#allocation2 + $0x8] sm:$0x3] %vm50_vm0, %v89_v34 }
  0x43   :  { %v97_v35 = vld [vmem:[#allocation2 + $0x8] sm:$0x3] }
  0x44   :  { %99 = vst.msk [vmem:[%s196_s2 + $0x8] sm:$0x3] %vm50_vm0, %v97_v35 }
  0x45   :  { %104 = vsyncpa [#allocation4], 1 }
  0x46   :  { %105 = vsyncpa [#allocation6], 1 }

</bundles_post_ra>
